<compile_context>
chip_gen: v7x
topology: tpu7x:2x2x1
jax: 0.10.0
libtpu: 0.0.40
codegen_flags: <defaults>
</compile_context>

<pallas_src>
import functools
from concurrent.futures import ThreadPoolExecutor

import numpy as np

import jax
import jax.numpy as jnp
from jax.experimental import pallas as pl
from jax.experimental.pallas import tpu as pltpu


# -----------------------------------------------------------------------------
# Pallas kernel: fused DETR matching-cost tile
#   cost[m, n] = bbox_w * ||b_m - t_n||_1
#              + (-class_w * prob_m[target_id_n])        (folded into onehot)
#              + giou_w  * (-GIoU(corners(b_m), corners(t_n)))
# Block layout per grid step (i over query-row tiles, j over target tiles):
#   logits_ref : (TM, C)   query logits tile                (index_map (i, 0))
#   qbox_ref   : (TM, 8)   query slab [cx,cy,w,h,x0,y0,x1,y1]
#   onehot_ref : (C,  TN)  (-class_w)-scaled one-hot         (index_map (0, j))
#   tbox_ref   : (8,  TN)  target slab, transposed           (index_map (0, j))
#   cost_ref   : (TM, TN)  lane-dense output tile
#   probs_ref  : (TM, C)   VMEM scratch — softmax cached per row tile
# -----------------------------------------------------------------------------
def _cost_kernel(logits_ref, qbox_ref, onehot_ref, tbox_ref, cost_ref, probs_ref,
                 *, bbox_w, giou_w):
    # Softmax over classes: computed once per row tile (first target tile) and
    # reused for all remaining target tiles from VMEM scratch.
    @pl.when(pl.program_id(1) == 0)
    def _():
        logits = logits_ref[...].astype(jnp.float32)               # (TM, C)
        mx = jnp.max(logits, axis=-1, keepdims=True)
        ex = jnp.exp(logits - mx)
        probs_ref[...] = ex / jnp.sum(ex, axis=-1, keepdims=True)

    probs = probs_ref[...]                                         # (TM, C)
    qbox = qbox_ref[...]                                           # (TM, 8)
    tbox = tbox_ref[...]                                           # (8, TN)

    # Class term: (-class_w) is already baked into the precomputed one-hot, so
    # the MXU result is the final scaled class cost.
    class_term = jnp.dot(probs, onehot_ref[...],
                         preferred_element_type=jnp.float32)       # (TM, TN)

    # Slabs: [cx, cy, w, h, x0, y0, x1, y1].
    bcx, bcy, bw_, bh_ = qbox[:, 0:1], qbox[:, 1:2], qbox[:, 2:3], qbox[:, 3:4]
    px0, py0, px1, py1 = qbox[:, 4:5], qbox[:, 5:6], qbox[:, 6:7], qbox[:, 7:8]
    tcx, tcy, tw_, th_ = tbox[0:1, :], tbox[1:2, :], tbox[2:3, :], tbox[3:4, :]
    tx0, ty0, tx1, ty1 = tbox[4:5, :], tbox[5:6, :], tbox[6:7, :], tbox[7:8, :]

    # L1 cdist over center-format boxes.
    bbox_cost = (jnp.abs(bcx - tcx) + jnp.abs(bcy - tcy)
                 + jnp.abs(bw_ - tw_) + jnp.abs(bh_ - th_))        # (TM, TN)

    # Generalized IoU cost with sign folded:  -giou = 1 - inter/union - union/enc.
    area_p = (px1 - px0) * (py1 - py0)                             # (TM, 1)
    area_t = (tx1 - tx0) * (ty1 - ty0)                             # (1, TN)
    inter_w = jnp.maximum(jnp.minimum(px1, tx1) - jnp.maximum(px0, tx0), 0.0)
    inter_h = jnp.maximum(jnp.minimum(py1, ty1) - jnp.maximum(py0, ty0), 0.0)
    inter = inter_w * inter_h
    union = area_p + area_t - inter
    enc_w = jnp.maximum(jnp.maximum(px1, tx1) - jnp.minimum(px0, tx0), 0.0)
    enc_h = jnp.maximum(jnp.maximum(py1, ty1) - jnp.minimum(py0, ty0), 0.0)
    enc = enc_w * enc_h
    # EUP approx reciprocals keep the divides off the saturated VPU slot.
    r_u = pl.reciprocal(union, approx=True)
    r_e = pl.reciprocal(enc, approx=True)
    giou_cost = 1.0 - inter * r_u - union * r_e                    # == -GIoU

    cost_ref[...] = bbox_w * bbox_cost + class_term + giou_w * giou_cost


# -----------------------------------------------------------------------------
# Wrapper: padding, precomputed slabs / one-hot, pallas_call.
# -----------------------------------------------------------------------------
def _round_up(x, m):
    return ((x + m - 1) // m) * m


def _pad_rows(x, total, fill_row):
    extra = total - x.shape[0]
    if extra == 0:
        return x
    pad = jnp.broadcast_to(jnp.asarray(fill_row, x.dtype), (extra,) + x.shape[1:])
    return jnp.concatenate([x, pad], axis=0)


def _box_slab(boxes):
    """(N, 4) center-format -> (N, 8) slab [cx, cy, w, h, x0, y0, x1, y1]."""
    cx, cy, w, h = boxes[:, 0], boxes[:, 1], boxes[:, 2], boxes[:, 3]
    return jnp.stack([cx, cy, w, h,
                      cx - 0.5 * w, cy - 0.5 * h,
                      cx + 0.5 * w, cy + 0.5 * h], axis=-1)


# Valid dummy slab (unit box) keeps GIoU finite on padded rows/columns.
_DUMMY_SLAB = np.array([0.5, 0.5, 1.0, 1.0, 0.0, 0.0, 1.0, 1.0], np.float32)


@functools.partial(jax.jit, static_argnames=("class_w", "bbox_w", "giou_w"))
def _detr_cost_matrix_padded(logits2d, boxes2d, target_ids, target_boxes,
                             *, class_w, bbox_w, giou_w):
    """logits2d (BQ, C), boxes2d (BQ, 4), target_ids (NT,), target_boxes (NT, 4)
    -> padded (BQ_pad, NT_pad) float32 cost matrix (caller slices on host)."""
    BQ, C = logits2d.shape
    NT = target_ids.shape[0]

    # Row tile: multiple of 8, <= 128 rows per step, and >= 2 grid steps
    # whenever BQ > 8 so both v7x TensorCores get work on the parallel axis.
    if BQ >= 256:
        TM = 128
    elif BQ > 8:
        TM = _round_up((BQ + 1) // 2, 8)
    else:
        TM = 8
    BQ_pad = _round_up(max(BQ, 1), TM)

    # Target tile: lane-dense multiple of 128, capped so (TM, TN) temps stay
    # well inside scoped VMEM on v5e/v6e/v7x.
    NT_pad = _round_up(max(NT, 1), 128)
    if NT_pad % 512 == 0:
        TN = 512
    elif NT_pad % 256 == 0:
        TN = 256
    else:
        TN = 128

    logits_p = _pad_rows(logits2d.astype(jnp.float32), BQ_pad,
                         np.zeros((C,), np.float32))
    qslab_p = _pad_rows(_box_slab(boxes2d.astype(jnp.float32)), BQ_pad,
                        _DUMMY_SLAB)                                  # (BQ_pad, 8)
    tslab_p = _pad_rows(_box_slab(target_boxes.astype(jnp.float32)), NT_pad,
                        _DUMMY_SLAB).T                                # (8, NT_pad)
    tids_p = _pad_rows(target_ids.astype(jnp.int32), NT_pad,
                       np.zeros((), np.int32))                        # (NT_pad,)

    # Grid-invariant (-class_w)-scaled one-hot selector, built once by XLA.
    onehot = jnp.where(
        jax.lax.broadcasted_iota(jnp.int32, (C, NT_pad), 0) == tids_p[None, :],
        jnp.float32(-class_w), jnp.float32(0.0))                      # (C, NT_pad)

    kernel = functools.partial(_cost_kernel,
                               bbox_w=float(bbox_w), giou_w=float(giou_w))

    cost = pl.pallas_call(
        kernel,
        out_shape=jax.ShapeDtypeStruct((BQ_pad, NT_pad), jnp.float32),
        grid=(BQ_pad // TM, NT_pad // TN),
        in_specs=[
            pl.BlockSpec((TM, C), lambda i, j: (i, 0)),
            pl.BlockSpec((TM, 8), lambda i, j: (i, 0)),
            pl.BlockSpec((C, TN), lambda i, j: (0, j)),
            pl.BlockSpec((8, TN), lambda i, j: (0, j)),
        ],
        out_specs=pl.BlockSpec((TM, TN), lambda i, j: (i, j)),
        scratch_shapes=[pltpu.VMEM((TM, C), jnp.float32)],
        compiler_params=pltpu.CompilerParams(
            dimension_semantics=("parallel", "arbitrary")),
    )(logits_p, qslab_p, onehot, tslab_p)
    return cost


# -----------------------------------------------------------------------------
# Host-side Hungarian assignment (NumPy Jonker-Volgenant / Kuhn-Munkres).
# TODO(synk): linear_sum_assignment is a sequential augmenting-path search with
# no Pallas/TPU equivalent; solved on host, matching the reference's .cpu() handoff.
# -----------------------------------------------------------------------------
def _linear_sum_assignment(cost):
    cost = np.asarray(cost, dtype=np.float64)
    R, Cc = cost.shape
    if min(R, Cc) == 0:
        return (np.zeros((0,), dtype=np.int64), np.zeros((0,), dtype=np.int64))
    transposed = Cc < R
    if transposed:
        cost = cost.T
    n, m = cost.shape                        # n <= m
    u = np.zeros(n + 1)
    v = np.zeros(m + 1)
    p = np.zeros(m + 1, dtype=np.int64)      # p[j] = row matched to column j (1-based)
    way = np.zeros(m + 1, dtype=np.int64)
    for i in range(1, n + 1):
        p[0] = i
        j0 = 0
        minv = np.full(m + 1, np.inf)
        used = np.zeros(m + 1, dtype=bool)
        while True:
            used[j0] = True
            i0 = p[j0]
            free = ~used[1:]
            cur = cost[i0 - 1, :] - u[i0] - v[1:]
            upd = free & (cur < minv[1:])
            minv[1:] = np.where(upd, cur, minv[1:])
            way[1:] = np.where(upd, j0, way[1:])
            masked = np.where(free, minv[1:], np.inf)
            j1 = int(np.argmin(masked)) + 1
            delta = masked[j1 - 1]
            np.add.at(u, p[used], delta)
            v[used] -= delta
            minv[~used] -= delta
            j0 = j1
            if p[j0] == 0:
                break
        while True:
            j1 = way[j0]
            p[j0] = p[j1]
            j0 = j1
            if j0 == 0:
                break
    row_ind, col_ind = [], []
    for j in range(1, m + 1):
        if p[j] != 0:
            row_ind.append(p[j] - 1)
            col_ind.append(j - 1)
    row_ind = np.asarray(row_ind, dtype=np.int64)
    col_ind = np.asarray(col_ind, dtype=np.int64)
    if transposed:
        row_ind, col_ind = col_ind, row_ind
    order = np.argsort(row_ind, kind="stable")
    return row_ind[order], col_ind[order]


# -----------------------------------------------------------------------------
# DetrHungarianMatcher (JAX version)
# -----------------------------------------------------------------------------
class DetrHungarianMatcher:
    def __init__(self, class_cost: float = 1.0, bbox_cost: float = 1.0,
                 giou_cost: float = 1.0):
        if class_cost == 0 and bbox_cost == 0 and giou_cost == 0:
            raise ValueError("All costs of the Matcher can't be 0")
        self.class_cost = float(class_cost)
        self.bbox_cost = float(bbox_cost)
        self.giou_cost = float(giou_cost)

    def __call__(self, outputs, targets):
        logits = outputs["logits"]                        # (B, Q, C)
        pred_boxes = outputs["pred_boxes"]                # (B, Q, 4) center format
        B, Q, C = logits.shape
        sizes = [int(t["boxes"].shape[0]) for t in targets]
        NT = sum(sizes)

        if NT == 0:
            empty = np.zeros((0,), dtype=np.int64)
            return [(empty, empty) for _ in targets]

        target_ids = jnp.concatenate(
            [t["class_labels"].astype(jnp.int32) for t in targets], axis=0)
        target_boxes = jnp.concatenate(
            [t["boxes"].astype(jnp.float32) for t in targets], axis=0)

        cost_padded = _detr_cost_matrix_padded(
            logits.reshape(B * Q, C), pred_boxes.reshape(B * Q, 4),
            target_ids, target_boxes,
            class_w=self.class_cost, bbox_w=self.bbox_cost,
            giou_w=self.giou_cost)

        # One D2H transfer of the padded cost; slice on the host (like the
        # reference's .cpu()).
        cost_np = np.asarray(jax.device_get(cost_padded))
        cost_np = cost_np[:B * Q, :NT].reshape(B, Q, NT)

        # Independent per-image Hungarian solves, run in a thread pool.
        offsets = np.concatenate([[0], np.cumsum(sizes)]).astype(np.int64)

        def solve(i):
            sub = cost_np[i, :, offsets[i]:offsets[i + 1]]
            return _linear_sum_assignment(sub)

        if B > 1:
            with ThreadPoolExecutor(max_workers=min(8, B)) as ex:
                results = list(ex.map(solve, range(B)))
        else:
            results = [solve(0)]

        # NumPy int64 outputs (reference returns int64 tensors); no per-batch
        # tiny H2D transfers.
        return [(row, col) for row, col in results]


# -----------------------------------------------------------------------------
# Self-test
# -----------------------------------------------------------------------------
def _reference_cost_np(logits, boxes, tids, tboxes, cw, bw, gw):
    logits = np.asarray(logits, np.float64).reshape(-1, logits.shape[-1])
    probs = np.exp(logits - logits.max(-1, keepdims=True))
    probs /= probs.sum(-1, keepdims=True)
    class_cost = -probs[:, np.asarray(tids)]
    b = np.asarray(boxes, np.float64).reshape(-1, 4)
    t = np.asarray(tboxes, np.float64)
    bbox_cost = np.abs(b[:, None, :] - t[None, :, :]).sum(-1)

    def corners(x):
        return np.stack([x[:, 0] - 0.5 * x[:, 2], x[:, 1] - 0.5 * x[:, 3],
                         x[:, 0] + 0.5 * x[:, 2], x[:, 1] + 0.5 * x[:, 3]], -1)

    pb, tb = corners(b), corners(t)
    area_p = (pb[:, 2] - pb[:, 0]) * (pb[:, 3] - pb[:, 1])
    area_t = (tb[:, 2] - tb[:, 0]) * (tb[:, 3] - tb[:, 1])
    lt = np.maximum(pb[:, None, :2], tb[None, :, :2])
    rb = np.minimum(pb[:, None, 2:], tb[None, :, 2:])
    wh = np.clip(rb - lt, 0, None)
    inter = wh[..., 0] * wh[..., 1]
    union = area_p[:, None] + area_t[None, :] - inter
    iou = inter / union
    lt2 = np.minimum(pb[:, None, :2], tb[None, :, :2])
    rb2 = np.maximum(pb[:, None, 2:], tb[None, :, 2:])
    wh2 = np.clip(rb2 - lt2, 0, None)
    enc = wh2[..., 0] * wh2[..., 1]
    giou = iou - (enc - union) / enc
    return bw * bbox_cost + cw * class_cost + gw * (-giou)


if __name__ == "__main__":
    key = jax.random.PRNGKey(0)
    B, Q, C = 2, 16, 8

    k1, k2, k3, k4 = jax.random.split(key, 4)
    logits = jax.random.normal(k1, (B, Q, C), dtype=jnp.float32)
    pred_cxy = jax.random.uniform(k2, (B, Q, 2), minval=0.25, maxval=0.75)
    pred_wh = jax.random.uniform(k3, (B, Q, 2), minval=0.10, maxval=0.40)
    pred_boxes = jnp.concatenate([pred_cxy, pred_wh], axis=-1)   # center format

    sizes = [3, 2]
    targets = []
    tkeys = jax.random.split(k4, 3 * len(sizes))
    for i, n in enumerate(sizes):
        ka, kb, kc = tkeys[3 * i], tkeys[3 * i + 1], tkeys[3 * i + 2]
        labels = jax.random.randint(ka, (n,), 0, C)
        cxy = jax.random.uniform(kb, (n, 2), minval=0.25, maxval=0.75)
        wh = jax.random.uniform(kc, (n, 2), minval=0.10, maxval=0.40)
        targets.append({"class_labels": labels,
                        "boxes": jnp.concatenate([cxy, wh], axis=-1)})

    # --- direct kernel check against a NumPy reference of the cost matrix ---
    tid_all = jnp.concatenate([t["class_labels"].astype(jnp.int32) for t in targets])
    tbox_all = jnp.concatenate([t["boxes"].astype(jnp.float32) for t in targets])
    NT = int(tid_all.shape[0])
    cost_dev = _detr_cost_matrix_padded(
        logits.reshape(B * Q, C), pred_boxes.reshape(B * Q, 4),
        tid_all, tbox_all, class_w=1.0, bbox_w=1.0, giou_w=1.0)
    jax.block_until_ready(cost_dev)
    cost_host = np.asarray(jax.device_get(cost_dev))[:B * Q, :NT]
    cost_ref = _reference_cost_np(np.asarray(logits), np.asarray(pred_boxes),
                                  np.asarray(tid_all), np.asarray(tbox_all),
                                  1.0, 1.0, 1.0)
    assert np.allclose(cost_host, cost_ref, atol=1e-2), \
        float(np.max(np.abs(cost_host - cost_ref)))

    # --- full matcher path ---
    matcher = DetrHungarianMatcher(class_cost=1.0, bbox_cost=1.0, giou_cost=1.0)
    indices = matcher({"logits": logits, "pred_boxes": pred_boxes}, targets)
    jax.block_until_ready(indices)

    assert len(indices) == B
    for (row, col), n in zip(indices, sizes):
        assert row.shape[0] == min(Q, n) and col.shape[0] == min(Q, n)
        assert row.dtype == np.int64 and col.dtype == np.int64
    print("KERNEL_OK")
</pallas_src>

<mosaic_0001>
module attributes {stable_mosaic.version = 11 : i64} {
  func.func @_cost_kernel(%arg0: i32, %arg1: i32, %arg2: memref<16x8xf32, #tpu.memory_space<vmem>>, %arg3: memref<16x8xf32, #tpu.memory_space<vmem>>, %arg4: memref<8x128xf32, #tpu.memory_space<vmem>>, %arg5: memref<8x128xf32, #tpu.memory_space<vmem>>, %arg6: memref<16x128xf32, #tpu.memory_space<vmem>>, %arg7: memref<16x8xf32, #tpu.memory_space<vmem>>) attributes {dimension_semantics = [#tpu.dimension_semantics<parallel>, #tpu.dimension_semantics<arbitrary>], iteration_bounds = array<i64: 2, 1>, scalar_prefetch = 0 : i64, scratch_operands = 1 : i64, tpu.core_type = #tpu.core_type<tc>, window_params = [{transform_indices = @transform_0, window_bounds = array<i64: 16, 8>}, {transform_indices = @transform_1, window_bounds = array<i64: 16, 8>}, {transform_indices = @transform_2, window_bounds = array<i64: 8, 128>}, {transform_indices = @transform_3, window_bounds = array<i64: 8, 128>}, {transform_indices = @transform_4, window_bounds = array<i64: 16, 128>}]} {
    %c0_i32 = arith.constant 0 : i32
    %0 = arith.cmpi eq, %arg1, %c0_i32 : i32
    %1 = arith.extui %0 : i1 to i32
    %c0_i32_0 = arith.constant 0 : i32
    %2 = arith.cmpi ne, %1, %c0_i32_0 : i32
    scf.if %2 {
      %c0_17 = arith.constant 0 : index
      %c0_18 = arith.constant 0 : index
      %105 = vector.load %arg2[%c0_17, %c0_18] : memref<16x8xf32, #tpu.memory_space<vmem>>, vector<16x8xf32>
      %cst_19 = arith.constant dense<0xFF800000> : vector<16xf32>
      %106 = vector.multi_reduction <maximumf>, %105, %cst_19 [1] : vector<16x8xf32> to vector<16xf32>
      %107 = vector.shape_cast %106 : vector<16xf32> to vector<16x1xf32>
      %108 = vector.broadcast %107 : vector<16x1xf32> to vector<16x8xf32>
      %109 = arith.subf %105, %108 : vector<16x8xf32>
      %110 = math.exp %109 : vector<16x8xf32>
      %cst_20 = arith.constant dense<0.000000e+00> : vector<16xf32>
      %111 = vector.multi_reduction <add>, %110, %cst_20 [1] : vector<16x8xf32> to vector<16xf32>
      %112 = vector.shape_cast %111 : vector<16xf32> to vector<16x1xf32>
      %113 = vector.broadcast %112 : vector<16x1xf32> to vector<16x8xf32>
      %114 = arith.divf %110, %113 : vector<16x8xf32>
      %c0_21 = arith.constant 0 : index
      %c0_22 = arith.constant 0 : index
      %115 = vector.load %arg7[%c0_21, %c0_22] : memref<16x8xf32, #tpu.memory_space<vmem>>, vector<16x8xf32>
      tpu.vector_store %arg7[%c0_21, %c0_22], %114 {strides = array<i32>} : memref<16x8xf32, #tpu.memory_space<vmem>>, vector<16x8xf32>,
    } else {
    }
    %c0 = arith.constant 0 : index
    %c0_1 = arith.constant 0 : index
    %3 = vector.load %arg7[%c0, %c0_1] : memref<16x8xf32, #tpu.memory_space<vmem>>, vector<16x8xf32>
    %c0_2 = arith.constant 0 : index
    %c0_3 = arith.constant 0 : index
    %4 = vector.load %arg3[%c0_2, %c0_3] : memref<16x8xf32, #tpu.memory_space<vmem>>, vector<16x8xf32>
    %c0_4 = arith.constant 0 : index
    %c0_5 = arith.constant 0 : index
    %5 = vector.load %arg5[%c0_4, %c0_5] : memref<8x128xf32, #tpu.memory_space<vmem>>, vector<8x128xf32>
    %c0_6 = arith.constant 0 : index
    %c0_7 = arith.constant 0 : index
    %6 = vector.load %arg4[%c0_6, %c0_7] : memref<8x128xf32, #tpu.memory_space<vmem>>, vector<8x128xf32>
    %cst = arith.constant dense<0.000000e+00> : vector<16x128xf32>
    %7 = tpu.matmul %3, %6, %cst {dimension_numbers = #tpu.dot_dimension_numbers<[1], [0], [0], [1], [0, 0, 1, 1], [], []>} : vector<16x8xf32>, vector<8x128xf32>, vector<16x128xf32> -> vector<16x128xf32>
    %8 = vector.extract_strided_slice %4 {offsets = [0, 0], sizes = [16, 1], strides = [1, 1]} : vector<16x8xf32> to vector<16x1xf32>
    %9 = vector.extract_strided_slice %4 {offsets = [0, 1], sizes = [16, 1], strides = [1, 1]} : vector<16x8xf32> to vector<16x1xf32>
    %10 = vector.extract_strided_slice %4 {offsets = [0, 2], sizes = [16, 1], strides = [1, 1]} : vector<16x8xf32> to vector<16x1xf32>
    %11 = vector.extract_strided_slice %4 {offsets = [0, 3], sizes = [16, 1], strides = [1, 1]} : vector<16x8xf32> to vector<16x1xf32>
    %12 = vector.extract_strided_slice %4 {offsets = [0, 4], sizes = [16, 1], strides = [1, 1]} : vector<16x8xf32> to vector<16x1xf32>
    %13 = vector.extract_strided_slice %4 {offsets = [0, 5], sizes = [16, 1], strides = [1, 1]} : vector<16x8xf32> to vector<16x1xf32>
    %14 = vector.extract_strided_slice %4 {offsets = [0, 6], sizes = [16, 1], strides = [1, 1]} : vector<16x8xf32> to vector<16x1xf32>
    %15 = vector.extract_strided_slice %4 {offsets = [0, 7], sizes = [16, 1], strides = [1, 1]} : vector<16x8xf32> to vector<16x1xf32>
    %16 = vector.extract_strided_slice %5 {offsets = [0, 0], sizes = [1, 128], strides = [1, 1]} : vector<8x128xf32> to vector<1x128xf32>
    %17 = vector.extract_strided_slice %5 {offsets = [1, 0], sizes = [1, 128], strides = [1, 1]} : vector<8x128xf32> to vector<1x128xf32>
    %18 = vector.extract_strided_slice %5 {offsets = [2, 0], sizes = [1, 128], strides = [1, 1]} : vector<8x128xf32> to vector<1x128xf32>
    %19 = vector.extract_strided_slice %5 {offsets = [3, 0], sizes = [1, 128], strides = [1, 1]} : vector<8x128xf32> to vector<1x128xf32>
    %20 = vector.extract_strided_slice %5 {offsets = [4, 0], sizes = [1, 128], strides = [1, 1]} : vector<8x128xf32> to vector<1x128xf32>
    %21 = vector.extract_strided_slice %5 {offsets = [5, 0], sizes = [1, 128], strides = [1, 1]} : vector<8x128xf32> to vector<1x128xf32>
    %22 = vector.extract_strided_slice %5 {offsets = [6, 0], sizes = [1, 128], strides = [1, 1]} : vector<8x128xf32> to vector<1x128xf32>
    %23 = vector.extract_strided_slice %5 {offsets = [7, 0], sizes = [1, 128], strides = [1, 1]} : vector<8x128xf32> to vector<1x128xf32>
    %24 = vector.broadcast %8 : vector<16x1xf32> to vector<16x128xf32>
    %25 = vector.broadcast %16 : vector<1x128xf32> to vector<16x128xf32>
    %26 = arith.subf %24, %25 : vector<16x128xf32>
    %27 = math.absf %26 : vector<16x128xf32>
    %28 = vector.broadcast %9 : vector<16x1xf32> to vector<16x128xf32>
    %29 = vector.broadcast %17 : vector<1x128xf32> to vector<16x128xf32>
    %30 = arith.subf %28, %29 : vector<16x128xf32>
    %31 = math.absf %30 : vector<16x128xf32>
    %32 = arith.addf %27, %31 : vector<16x128xf32>
    %33 = vector.broadcast %10 : vector<16x1xf32> to vector<16x128xf32>
    %34 = vector.broadcast %18 : vector<1x128xf32> to vector<16x128xf32>
    %35 = arith.subf %33, %34 : vector<16x128xf32>
    %36 = math.absf %35 : vector<16x128xf32>
    %37 = arith.addf %32, %36 : vector<16x128xf32>
    %38 = vector.broadcast %11 : vector<16x1xf32> to vector<16x128xf32>
    %39 = vector.broadcast %19 : vector<1x128xf32> to vector<16x128xf32>
    %40 = arith.subf %38, %39 : vector<16x128xf32>
    %41 = math.absf %40 : vector<16x128xf32>
    %42 = arith.addf %37, %41 : vector<16x128xf32>
    %43 = arith.subf %14, %12 : vector<16x1xf32>
    %44 = arith.subf %15, %13 : vector<16x1xf32>
    %45 = arith.mulf %43, %44 : vector<16x1xf32>
    %46 = arith.subf %22, %20 : vector<1x128xf32>
    %47 = arith.subf %23, %21 : vector<1x128xf32>
    %48 = arith.mulf %46, %47 : vector<1x128xf32>
    %49 = vector.broadcast %14 : vector<16x1xf32> to vector<16x128xf32>
    %50 = vector.broadcast %22 : vector<1x128xf32> to vector<16x128xf32>
    %51 = arith.minimumf %49, %50 : vector<16x128xf32>
    %52 = vector.broadcast %12 : vector<16x1xf32> to vector<16x128xf32>
    %53 = vector.broadcast %20 : vector<1x128xf32> to vector<16x128xf32>
    %54 = arith.maximumf %52, %53 : vector<16x128xf32>
    %55 = arith.subf %51, %54 : vector<16x128xf32>
    %cst_8 = arith.constant 0.000000e+00 : f32
    %56 = vector.broadcast %cst_8 : f32 to vector<16x128xf32>
    %57 = arith.maximumf %55, %56 : vector<16x128xf32>
    %58 = vector.broadcast %15 : vector<16x1xf32> to vector<16x128xf32>
    %59 = vector.broadcast %23 : vector<1x128xf32> to vector<16x128xf32>
    %60 = arith.minimumf %58, %59 : vector<16x128xf32>
    %61 = vector.broadcast %13 : vector<16x1xf32> to vector<16x128xf32>
    %62 = vector.broadcast %21 : vector<1x128xf32> to vector<16x128xf32>
    %63 = arith.maximumf %61, %62 : vector<16x128xf32>
    %64 = arith.subf %60, %63 : vector<16x128xf32>
    %cst_9 = arith.constant 0.000000e+00 : f32
    %65 = vector.broadcast %cst_9 : f32 to vector<16x128xf32>
    %66 = arith.maximumf %64, %65 : vector<16x128xf32>
    %67 = arith.mulf %57, %66 : vector<16x128xf32>
    %68 = vector.broadcast %45 : vector<16x1xf32> to vector<16x128xf32>
    %69 = vector.broadcast %48 : vector<1x128xf32> to vector<16x128xf32>
    %70 = arith.addf %68, %69 : vector<16x128xf32>
    %71 = arith.subf %70, %67 : vector<16x128xf32>
    %72 = vector.broadcast %14 : vector<16x1xf32> to vector<16x128xf32>
    %73 = vector.broadcast %22 : vector<1x128xf32> to vector<16x128xf32>
    %74 = arith.maximumf %72, %73 : vector<16x128xf32>
    %75 = vector.broadcast %12 : vector<16x1xf32> to vector<16x128xf32>
    %76 = vector.broadcast %20 : vector<1x128xf32> to vector<16x128xf32>
    %77 = arith.minimumf %75, %76 : vector<16x128xf32>
    %78 = arith.subf %74, %77 : vector<16x128xf32>
    %cst_10 = arith.constant 0.000000e+00 : f32
    %79 = vector.broadcast %cst_10 : f32 to vector<16x128xf32>
    %80 = arith.maximumf %78, %79 : vector<16x128xf32>
    %81 = vector.broadcast %15 : vector<16x1xf32> to vector<16x128xf32>
    %82 = vector.broadcast %23 : vector<1x128xf32> to vector<16x128xf32>
    %83 = arith.maximumf %81, %82 : vector<16x128xf32>
    %84 = vector.broadcast %13 : vector<16x1xf32> to vector<16x128xf32>
    %85 = vector.broadcast %21 : vector<1x128xf32> to vector<16x128xf32>
    %86 = arith.minimumf %84, %85 : vector<16x128xf32>
    %87 = arith.subf %83, %86 : vector<16x128xf32>
    %cst_11 = arith.constant 0.000000e+00 : f32
    %88 = vector.broadcast %cst_11 : f32 to vector<16x128xf32>
    %89 = arith.maximumf %87, %88 : vector<16x128xf32>
    %90 = arith.mulf %80, %89 : vector<16x128xf32>
    %91 = tpu.reciprocal %71 {approx = true} : vector<16x128xf32> -> vector<16x128xf32>
    %92 = tpu.reciprocal %90 {approx = true} : vector<16x128xf32> -> vector<16x128xf32>
    %93 = arith.mulf %67, %91 : vector<16x128xf32>
    %cst_12 = arith.constant 1.000000e+00 : f32
    %94 = vector.broadcast %cst_12 : f32 to vector<16x128xf32>
    %95 = arith.subf %94, %93 : vector<16x128xf32>
    %96 = arith.mulf %71, %92 : vector<16x128xf32>
    %97 = arith.subf %95, %96 : vector<16x128xf32>
    %cst_13 = arith.constant 1.000000e+00 : f32
    %98 = vector.broadcast %cst_13 : f32 to vector<16x128xf32>
    %99 = arith.mulf %98, %42 : vector<16x128xf32>
    %100 = arith.addf %99, %7 : vector<16x128xf32>
    %cst_14 = arith.constant 1.000000e+00 : f32
    %101 = vector.broadcast %cst_14 : f32 to vector<16x128xf32>
    %102 = arith.mulf %101, %97 : vector<16x128xf32>
    %103 = arith.addf %100, %102 : vector<16x128xf32>
    %c0_15 = arith.constant 0 : index
    %c0_16 = arith.constant 0 : index
    %104 = vector.load %arg6[%c0_15, %c0_16] : memref<16x128xf32, #tpu.memory_space<vmem>>, vector<16x128xf32>
    tpu.vector_store %arg6[%c0_15, %c0_16], %103 {strides = array<i32>} : memref<16x128xf32, #tpu.memory_space<vmem>>, vector<16x128xf32>,
    return
  }
  func.func @transform_0(%arg0: i32, %arg1: i32) -> (i32, i32) {
    %c0_i32 = arith.constant 0 : i32
    %c0_i32_0 = arith.constant 0 : i32
    return %arg0, %c0_i32 : i32, i32
  }
  func.func @transform_1(%arg0: i32, %arg1: i32) -> (i32, i32) {
    %c0_i32 = arith.constant 0 : i32
    %c0_i32_0 = arith.constant 0 : i32
    return %arg0, %c0_i32 : i32, i32
  }
  func.func @transform_2(%arg0: i32, %arg1: i32) -> (i32, i32) {
    %c0_i32 = arith.constant 0 : i32
    %c0_i32_0 = arith.constant 0 : i32
    return %c0_i32, %arg1 : i32, i32
  }
  func.func @transform_3(%arg0: i32, %arg1: i32) -> (i32, i32) {
    %c0_i32 = arith.constant 0 : i32
    %c0_i32_0 = arith.constant 0 : i32
    return %c0_i32, %arg1 : i32, i32
  }
  func.func @transform_4(%arg0: i32, %arg1: i32) -> (i32, i32) {
    %c0_i32 = arith.constant 0 : i32
    return %arg0, %arg1 : i32, i32
  }
}

</mosaic_0001>

<bundles_post_ra>
// kernel: _detr_cost_matrix_padded.1
= control target key start
LH: loop header
LB: loop body
LE: loop exit
PB: predicated region body
PF: predicated region fallthrough
CT: control target
= control target key end

     0   :  { %9 = vsyncpa [#allocation4], 0  ;;  %s1176_s0 = inlined_call_operand.vmem [shape: f32[32,8], index: 0, kind: input, shape index: {}]   ;;  %s1177_s1 = inlined_call_operand.vmem [shape: f32[32,8], index: 1, kind: input, shape index: {}]   ;;  %s1178_s2 = inlined_call_operand.vmem [shape: f32[8,128], index: 2, kind: input, shape index: {}]   ;;  %s1179_s3 = inlined_call_operand.vmem [shape: f32[8,128], index: 3, kind: input, shape index: {}]   ;;  %s1180_s4 = inlined_call_operand.hbm [shape: f32[32,128], index: 4, kind: output, shape index: {}]  }
   0x1   :  { %11 = vsyncpa [#allocation4 + $0x1], 0  ;;  %s979_s15 = smov 0   ;;  %s981_s16 = smov 0  }
   0x2   :  { %s983_s17 = smov 0   ;;  %s985_s18 = smov 0  }
   0x3   :  { %s987_s19 = smov 0   ;;  %s989_s20 = smov 0  }
   0x4 LB: > { %s735_s21 = sadd.s32 4294967295, %s939_s20   ;;  %s736_s22 = sadd.s32 4294967294, %s939_s20   ;;  %s939_s20 = sphi %s989_s20, %s17_s20   ;;  %s935_s19 = sphi %s987_s19, %s1187_s19   ;;  %s931_s18 = sphi %s985_s18, %s1186_s18   ;;  %s927_s17 = sphi %s983_s17, %s1185_s17   ;;  %s923_s16 = sphi %s981_s16, %s1184_s16   ;;  %s919_s15 = sphi %s979_s15, %s1183_s15  }
   0x5   : > { %s29_s23 = sadd.s32 1, %s935_s19  ;;  %s142_s24 = sadd.s32 1, %s927_s17 }
   0x6   : > { %p31_p0 = scmp.ge.s32.totalorder %s29_s23, 2  ;;  %p152_p1 = scmp.ne.s32.totalorder %s927_s17, %s923_s16 }
   0x7   : > { %p153_p2 = scmp.eq.s32.totalorder %s735_s21, 1  ;;  %p158_p3 = scmp.ne.s32.totalorder %s923_s16, %s919_s15 }
   0x8   : > { %s1189_s23 = smov (%p31_p0, %s29_s23), 0  ;;  %p159_p5 = scmp.eq.s32.totalorder %s736_s22, 1 }
   0x9   : > { %p1019_p4 = por %p153_p2, %p152_p1  ;;  %s137_s26 = ssub.s32 %s935_s19, %s1189_s23 }
   0xa   : > { %p741_p6 = scmp.ge.s32.totalorder %s939_s20, 1  ;;  %p140_p7 = scmp.eq.s32.totalorder %s137_s26, 0 }
   0xb   : > { %p1026_p8 = por %p159_p5, %p158_p3  ;;  %p209_p9 = scmp.lt.s32.totalorder %s939_s20, 3 }
   0xc   : > { %s1032_s28 = scalar_select %p140_p7, %s927_s17, %s142_s24  }
   0xd   : > { %p210_p10 = pnand %p741_p6, %p209_p9 }
   0xe   : > { %s743_s29 = sshll.u32 (!%p210_p10), %s931_s18, 1  ;;  %vm275_vm0 = vcmask (!%p210_p10), 64512   ;;  %s941_s11 = smov (!%p210_p10), 2   ;;  %v943_v18 = vmov (!%p210_p10), 6   ;;  %v944_v19 = vmov (!%p210_p10), 4   ;;  %v305_v20 = vld [vmem:[%s1178_s2] sm:$0xff] (!%p210_p10)  ;;  %v398_v44 = vlaneseq (!%p210_p10) }
   0xf   : > { %213 = sbr.rel (%p210_p10) target bundleno = 620 (0x26c), region = 36  ;;  %p249_p11 = scmp.lt.s32.totalorder (!%p210_p10), %s743_s29, 3  ;;  %830 = vset.pattern.permute.xlu1 (!%p210_p10), %v943_v18  ;;  %832 = vset.pattern.permute.xlu0 (!%p210_p10), %v944_v19  ;;  %v945_v21 = vmov (!%p210_p10), 5   ;;  %v946_v31 = vmov (!%p210_p10), 7   ;;  %v947_v33 = vmov (!%p210_p10), 0   ;;  %v948_v36 = vmov (!%p210_p10), 1  }
  0x10   : > { %s942_s12 = smov (!%p210_p10), 127   ;;  %758 = vmatprep.subr.mxu0 (!%p210_p10), %v305_v20  ;;  %v949_v37 = vmov (!%p210_p10), 2   ;;  %v950_v38 = vmov (!%p210_p10), 3   ;;  %v1080_v47 = vshrl.u32 (!%p210_p10), %v398_v44, 7  ;;  %v1085_v48 = vld [vmem:[%s1179_s3] sm:$0xff] (!%p210_p10)  ;;  %s245_s24 = sand.u32 (!%p210_p10), 1, %s923_s16  }
  0x11   : > { %759 = vmatpush3.msra.mxu0 (!%p210_p10), %v305_v20  ;;  %v479_v50 = vrot.slane (!%p210_p10), %v1085_v48, 6  ;;  %s742_s26 = sshll.u32 (!%p210_p10), %s245_s24, 4 }
  0x12   : > { %v542_v51 = vsub.s32 (!%p210_p10), 5, %v1080_v47  ;;  %v496_v53 = vsub.s32 (!%p210_p10), 6, %v1080_v47  ;;  %v510_v54 = vsub.s32 (!%p210_p10), 4, %v1080_v47  ;;  %v528_v55 = vsub.s32 (!%p210_p10), 7, %v1080_v47 }
  0x13   : > { %v481_v56 = vsub.f32 (!%p210_p10), %v1085_v48, %v479_v50  ;;  %v416_v44 = vsub.s32 (!%p210_p10), 1, %v1080_v47 }
  0x14   : > { %v543_v57 = vrot.slane (!%p210_p10), %v1085_v48, %v542_v51  ;;  %v497_v59 = vrot.slane (!%p210_p10), %v1085_v48, %v496_v53  ;;  %v511_v60 = vrot.slane (!%p210_p10), %v1085_v48, %v510_v54  ;;  %v529_v61 = vrot.slane (!%p210_p10), %v1085_v48, %v528_v55 }
  0x16   : > { %s1191_s29 = smov (!%p249_p11, %s743_s29), 3 }
  0x17   : > { %s744_s30 = sshll.u32 %s1191_s29, 3  ;;  %s754_s29 = sshll.u32 %s931_s18, 8 }
  0x18   : > { %s252_s7 = scalar_lea.vmem %s1176_s0, %s744_s30  ;;  %s258_s10 = scalar_lea.vmem %s1177_s1, %s744_s30 }
  0x19   : > { %v273_v0 = vld [vmem:[%s252_s7] sm:$0xff]  ;;  %v274_v2 = vld [vmem:[%s252_s7 + $0x8] sm:$0xff]  ;;  %s247_s30 = scalar_lea.vmem [#allocation3], %s742_s26  ;;  %s1124_s8 = scalar_lea.hbm %s1180_s4, %s754_s29 }
  0x1a   : > { %v276_v1 = vsel %vm275_vm0, %v273_v0, -inf  ;;  %v279_v3 = vsel %vm275_vm0, %v274_v2, -inf  ;;  %v1043_v4 = vld [vmem:[%s258_s10] sm:$0xff]  ;;  %v1048_v15 = vld [vmem:[%s258_s10 + $0x8] sm:$0xff]  ;;  %s621_s5 = sshll.u32 %s247_s30, 4  ;;  %s1130_s18 = scalar_lea.sflag [#allocation4], %s245_s24  ;;  %s1126_s5 = int_to_ptr.vmem [resolvable:$true] %s621_s5 }
  0x1b   : > { %277 = vmax.xlane.f32.xlu0 %v276_v1  ;;  %s861_s9 = scalar_lea.vmem %s1126_s5, 256  ;;  %s951_s10 = smov [#allocation3]  }
  0x1c   : > { %p862_p12 = scmp.ne.s32.totalorder %s1126_s5, %s861_s9 }
  0x1e   : > { %p863_p13 = pnand %p862_p12, %p1019_p4 }
  0x1f   : > { %280 = vmax.xlane.f32.xlu0 %v279_v3  ;;  %v483_v3 = vrot.slane %v481_v56, 1 }
  0x20   : > { %p864_p0 = pneg %p863_p13 }
  0x35   : > { %460 = vrot.lane.b32.xlu0 %v1043_v4, %s941_s11 }
  0x39   : > { %505 = vperm.xlu0 %832, %v1048_v15  }
  0x3d   : > { %834 = vset.pattern.permute.xlu0 %v945_v21 }
  0x3e   : > { %533 = vperm.xlu0 %834, %v1043_v4  }
  0x42   : > { %835 = vset.pattern.permute.xlu0 %v943_v18 }
  0x43   : > { %487 = vperm.xlu0 %835, %v1043_v4  }
  0xa8   : > { %v278_v5 = vpop.xlane.xlu0 %277 }
  0xa9   : > { %v282_v6 = vsub.f32 %v273_v0, %v278_v5 }
  0xab   : > { %v284_v7 = vmul.f32 1.442695, %v282_v6 }
  0xac   : > { %v281_v8 = vpop.xlane.xlu0 %280 }
  0xad   : > { %845 = vpow2.f32 %v284_v7  ;;  %v283_v9 = vsub.f32 %v274_v2, %v281_v8  ;;  %v485_v7 = vmul.f32 %v483_v3, %v481_v56 }
  0xaf   : > { %v286_v10 = vmul.f32 1.442695, %v283_v9 }
  0xb0   : > { %v461_v16 = vpop.permute.xlu0 %460 }
  0xb1   : > { %847 = vpow2.f32 %v286_v10  ;;  %v466_v17 = vsub.f32 %v1043_v4, %v461_v16 }
  0xb7   : > { %v846_v11 = vpop.eup %845 }
  0xb8   : > { %v288_v12 = vsel %vm275_vm0, %v846_v11, 0.0  ;;  %v506_v46 = vpop.permute.xlu0 %505 }
  0xb9   : > { %289 = vadd.xlane.f32.xlu1 %v288_v12 }
  0xbb   : > { %v848_v13 = vpop.eup %847 }
  0xbc   : > { %v291_v14 = vsel %vm275_vm0, %v848_v13, 0.0 }
  0xbd   : > { %292 = vadd.xlane.f32.xlu1 %v291_v14  ;;  %v534_v52 = vpop.permute.xlu0 %533 }
  0xbe   : > { %v544_v62 = vmax.f32 %v534_v52, %v543_v57  ;;  %v580_v16 = vmin.f32 %v534_v52, %v543_v57  ;;  %v417_v52 = vrot.slane %v1085_v48, %v416_v44 }
  0xc2   : > { %v488_v63 = vpop.permute.xlu0 %487 }
  0xc3   : > { %v498_v2 = vmin.f32 %v488_v63, %v497_v59 }
  0xce   : > { %462 = vrot.lane.b32.xlu1 %v1048_v15, %s941_s11  ;;  %s865_s11 = sshll.u32 %s951_s10, 4  ;;  %s866_s11 = int_to_ptr.vmem [resolvable:$false] %s865_s11 }
  0xcf   : > { %p868_p1 = scmp.lt.s32.totalorder %s1126_s5, %s866_s11 }
  0xd2   : > { %470 = vrot.lane.b32.xlu1 %v466_v17, %s942_s12 }
 0x146   : > { %v290_v22 = vpop.xlane.xlu1 %289 }
 0x147   : > { %849 = vrcp.f32 %v290_v22 }
 0x14a   : > { %v293_v23 = vpop.xlane.xlu1 %292 }
 0x14b   : > { %851 = vrcp.f32 %v293_v23 }
 0x14e   : > { %v463_v24 = vpop.permute.xlu1 %462 }
 0x14f   : > { %v467_v25 = vsub.f32 %v1048_v15, %v463_v24 }
 0x151   : > { %v850_v26 = vpop.eup %849  ;;  %472 = vrot.lane.b32.xlu1 %v467_v25, %s942_s12  ;;  %s867_s12 = scalar_lea.vmem %s866_s11, 512 }
 0x152   : > { %v295_v27 = vmul.f32 %v850_v26, %v846_v11  ;;  %v471_v34 = vpop.permute.xlu1 %470  ;;  %v565_v11 = vrot.slane %v485_v7, %v496_v53  ;;  %v573_v26 = vmin.f32 %v506_v46, %v511_v60  ;;  %p869_p2 = scmp.lt.s32.totalorder %s867_s12, %s861_s9 }
 0x153   : > { %v476_v35 = vmul.f32 %v471_v34, %v466_v17  ;;  %v570_v17 = vmax.f32 %v488_v63, %v497_v59 }
 0x154   : > { %298 = vst.msk [vmem:[#allocation2] sm:$0xff] %vm275_vm0, %v295_v27  ;;  %p870_p3 = por %p869_p2, %p868_p1 }
 0x155   : > { %v852_v28 = vpop.eup %851  ;;  %491 = vperm.xlu1 %830, %v1048_v15  }
 0x156   : > { %v297_v29 = vmul.f32 %v852_v28, %v848_v13  ;;  %p871_p5 = pnand %p870_p3, %p864_p0 }
 0x158   : > { %299 = vst.msk [vmem:[#allocation2 + $0x8] sm:$0xff] %vm275_vm0, %v297_v29 }
 0x159   : > { %831 = vset.pattern.permute.xlu1 %v944_v19 }
 0x15a   : > { %501 = vperm.xlu1 %831, %v1043_v4  }
 0x15b   : > { %v300_v30 = vld [vmem:[#allocation2] sm:$0xff] }
 0x15c   : > { %760 = vmatprep.mubr.msk.f32.mxu0 %vm275_vm0, %v300_v30 }
 0x15e   : > { %833 = vset.pattern.permute.xlu1 %v946_v31 }
 0x15f   : > { %519 = vperm.xlu1 %833, %v1043_v4   ;;  %v301_v32 = vld [vmem:[#allocation2 + $0x8] sm:$0xff] }
 0x160   : > { %761 = vmatmul.mubr.msk.f32.vlgmr.msra.gmra.mrb[0].mxu0 %vm275_vm0, %v301_v32 }
 0x163   : > { %523 = vperm.xlu1 %833, %v1048_v15  }
 0x167   : > { %836 = vset.pattern.permute.xlu1 %v945_v21  ;;  %v513_v21 = vmax.f32 %v506_v46, %v511_v60 }
 0x168   : > { %537 = vperm.xlu1 %836, %v1048_v15  }
 0x16c   : > { %837 = vset.pattern.permute.xlu1 %v947_v33 }
 0x16d   : > { %390 = vperm.xlu1 %837, %v1043_v4  }
 0x171   : > { %395 = vperm.xlu1 %837, %v1048_v15  }
 0x175   : > { %838 = vset.pattern.permute.xlu1 %v943_v18 }
 0x176   : > { %554 = vperm.xlu1 %838, %v476_v35  }
 0x17a   : > { %840 = vset.pattern.permute.xlu1 %v948_v36 }
 0x17b   : > { %411 = vperm.xlu1 %840, %v1048_v15  }
 0x17f   : > { %841 = vset.pattern.permute.xlu1 %v949_v37 }
 0x180   : > { %425 = vperm.xlu1 %841, %v1043_v4  }
 0x184   : > { %843 = vset.pattern.permute.xlu1 %v950_v38  ;;  %v400_v38 = vsub.s32 0, %v1080_v47 }
 0x185   : > { %443 = vperm.xlu1 %843, %v1043_v4  }
 0x186   : > { %v401_v50 = vrot.slane %v1085_v48, %v400_v38 }
 0x189   : > { %447 = vperm.xlu1 %843, %v1048_v15  }
 0x1c3   : > { %v473_v39 = vpop.permute.xlu1 %472 }
 0x1c4   : > { %v477_v40 = vmul.f32 %v473_v39, %v467_v25 }
 0x1c6   : > { %559 = vperm.xlu0 %835, %v477_v40  }
 0x1ca   : > { %839 = vset.pattern.permute.xlu0 %v948_v36 }
 0x1cb   : > { %407 = vperm.xlu0 %839, %v1043_v4  }
 0x1cf   : > { %842 = vset.pattern.permute.xlu0 %v949_v37 }
 0x1d0   : > { %429 = vperm.xlu0 %842, %v1048_v15  }
 0x1d4   : > { %844 = vset.pattern.permute.xlu0 %v943_v18  ;;  %v492_v41 = vpop.permute.xlu1 %491 }
 0x1d5   : > { %v499_v20 = vmin.f32 %v492_v41, %v497_v59  ;;  %v571_v27 = vmax.f32 %v492_v41, %v497_v59  ;;  %v434_v41 = vsub.s32 2, %v1080_v47 }
 0x1d7   : > { %v515_v32 = vsub.f32 %v499_v20, %v513_v21  ;;  %v575_v36 = vsub.f32 %v571_v27, %v573_v26  ;;  %v435_v55 = vrot.slane %v1085_v48, %v434_v41 }
 0x1d9   : > { %v502_v42 = vpop.permute.xlu1 %501  ;;  %v517_v40 = vmax.f32 %v515_v32, 0.0  ;;  %v577_v46 = vmax.f32 %v575_v36, 0.0 }
 0x1da   : > { %v512_v0 = vmax.f32 %v502_v42, %v511_v60  ;;  %v572_v14 = vmin.f32 %v502_v42, %v511_v60 }
 0x1dc   : > { %v514_v6 = vsub.f32 %v498_v2, %v512_v0  ;;  %v574_v24 = vsub.f32 %v570_v17, %v572_v14 }
 0x1de   : > { %v520_v43 = vpop.permute.xlu1 %519  ;;  %v516_v10 = vmax.f32 %v514_v6, 0.0  ;;  %v576_v34 = vmax.f32 %v574_v24, 0.0 }
 0x1df   : > { %v530_v1 = vmin.f32 %v520_v43, %v529_v61  ;;  %v578_v15 = vmax.f32 %v520_v43, %v529_v61 }
 0x1e1   : > { %v546_v5 = vsub.f32 %v530_v1, %v544_v62  ;;  %v582_v22 = vsub.f32 %v578_v15, %v580_v16 }
 0x1e2   : > { %v524_v45 = vpop.permute.xlu1 %523 }
 0x1e3   : > { %v548_v9 = vmax.f32 %v546_v5, 0.0  ;;  %v531_v23 = vmin.f32 %v524_v45, %v529_v61  ;;  %v579_v28 = vmax.f32 %v524_v45, %v529_v61  ;;  %v584_v33 = vmax.f32 %v582_v22, 0.0 }
 0x1e4   : > { %v452_v45 = vsub.s32 3, %v1080_v47 }
 0x1e5   : > { %v550_v18 = vmul.f32 %v548_v9, %v516_v10  ;;  %v586_v42 = vmul.f32 %v584_v33, %v576_v34 }
 0x1e6   : > { %v453_v56 = vrot.slane %v1085_v48, %v452_v45 }
 0x1e7   : > { %v538_v49 = vpop.permute.xlu1 %537 }
 0x1e8   : > { %v545_v25 = vmax.f32 %v538_v49, %v543_v57  ;;  %v581_v29 = vmin.f32 %v538_v49, %v543_v57 }
 0x1ea   : > { %v547_v35 = vsub.f32 %v531_v23, %v545_v25  ;;  %v583_v37 = vsub.f32 %v579_v28, %v581_v29 }
 0x1ec   : > { %v1094_v58 = vpop.permute.xlu1 %390  ;;  %v549_v43 = vmax.f32 %v547_v35, 0.0  ;;  %v585_v49 = vmax.f32 %v583_v37, 0.0 }
 0x1ed   : > { %v402_v61 = vsub.f32 %v1094_v58, %v401_v50 }
 0x1ee   : > { %v551_v53 = vmul.f32 %v549_v43, %v517_v40  ;;  %v587_v59 = vmul.f32 %v585_v49, %v577_v46 }
 0x1ef   : > { %v404_v5 = vand.u32 2147483647, %v402_v61 }
 0x1f0   : > { %v1099_v4 = vpop.permute.xlu1 %395 }
 0x1f1   : > { %v403_v62 = vsub.f32 %v1099_v4, %v401_v50 }
 0x1f3   : > { %v405_v9 = vand.u32 2147483647, %v403_v62 }
 0x1f5   : > { %v555_v13 = vpop.permute.xlu1 %554 }
 0x1f6   : > { %v566_v19 = vadd.f32 %v565_v11, %v555_v13 }
 0x1f8   : > { %v568_v30 = vsub.f32 %v566_v19, %v550_v18 }
 0x1fa   : > { %v412_v31 = vpop.permute.xlu1 %411  ;;  %853 = vrcp.f32 %v568_v30 }
 0x1fb   : > { %855 = vrcp.f32 %v586_v42  ;;  %v419_v63 = vsub.f32 %v412_v31, %v417_v52 }
 0x1fd   : > { %v421_v10 = vand.u32 2147483647, %v419_v63 }
 0x1ff   : > { %v426_v39 = vpop.permute.xlu1 %425  ;;  %v423_v20 = vadd.f32 %v421_v10, %v405_v9 }
 0x200   : > { %v436_v1 = vsub.f32 %v426_v39, %v435_v55 }
 0x204   : > { %v444_v57 = vpop.permute.xlu1 %443  ;;  %v854_v47 = vpop.eup %853 }
 0x205   : > { %v454_v2 = vsub.f32 %v444_v57, %v453_v56  ;;  %v592_v6 = vmul.f32 %v854_v47, %v550_v18  ;;  %v856_v4 = vpop.eup %855 }
 0x206   : > { %v596_v22 = vmul.f32 %v856_v4, %v568_v30 }
 0x207   : > { %v456_v58 = vand.u32 2147483647, %v454_v2  ;;  %v594_v17 = vsub.f32 1.0, %v592_v6 }
 0x208   : > { %v448_v48 = vpop.permute.xlu1 %447 }
 0x209   : > { %v455_v15 = vsub.f32 %v448_v48, %v453_v56  ;;  %v598_v26 = vsub.f32 %v594_v17, %v596_v22 }
 0x20b   : > { %v457_v24 = vand.u32 2147483647, %v455_v15 }
 0x233   : > { %v1101_v8 = vpop.f32.mrb[0].mxu0 }
 0x234   : > { %v1103_v12 = vpop.f32.mrb[1].mxu0 }
 0x245   : > { %v560_v51 = vpop.permute.xlu0 %559 }
 0x246   : > { %v567_v54 = vadd.f32 %v565_v11, %v560_v51  ;;  %v438_v11 = vand.u32 2147483647, %v436_v1 }
 0x248   : > { %v569_v60 = vsub.f32 %v567_v54, %v551_v53 }
 0x24a   : > { %857 = vrcp.f32 %v569_v60  ;;  %v408_v0 = vpop.permute.xlu0 %407 }
 0x24b   : > { %v418_v3 = vsub.f32 %v408_v0, %v417_v52  ;;  %859 = vrcp.f32 %v587_v59 }
 0x24d   : > { %v420_v7 = vand.u32 2147483647, %v418_v3 }
 0x24f   : > { %v422_v13 = vadd.f32 %v420_v7, %v404_v5  ;;  %v430_v14 = vpop.permute.xlu0 %429 }
 0x250   : > { %v437_v16 = vsub.f32 %v430_v14, %v435_v55 }
 0x251   : > { %v440_v19 = vadd.f32 %v438_v11, %v422_v13 }
 0x252   : > { %v439_v21 = vand.u32 2147483647, %v437_v16 }
 0x253   : > { %v458_v18 = vadd.f32 %v456_v58, %v440_v19 }
 0x254   : > { %v858_v23 = vpop.eup %857  ;;  %v441_v25 = vadd.f32 %v439_v21, %v423_v20 }
 0x255   : > { %v593_v27 = vmul.f32 %v858_v23, %v551_v53  ;;  %v600_v28 = vadd.f32 %v458_v18, %v1103_v12  ;;  %v860_v29 = vpop.eup %859 }
 0x256   : > { %v459_v31 = vadd.f32 %v457_v24, %v441_v25  ;;  %v597_v33 = vmul.f32 %v860_v29, %v569_v60 }
 0x257   : > { %v595_v32 = vsub.f32 1.0, %v593_v27  ;;  %v602_v34 = vadd.f32 %v600_v28, %v598_v26 }
 0x258   : > { %v601_v30 = vadd.f32 %v1101_v8, %v459_v31 }
 0x259   : > { %v599_v35 = vsub.f32 %v595_v32, %v597_v33  ;;  %604 = vst [vmem:[%s247_s30] sm:$0xff] %v602_v34 }
 0x25b   : > { %v603_v12 = vadd.f32 %v601_v30, %v599_v35 }
 0x25d   : > { %605 = vst [vmem:[%s247_s30 + $0x8] sm:$0xff] %v603_v12 }
 0x25e   : > { %874 = shalt.err (!%p871_p5)
}
 0x25f   : > { %s875_s13 = scalar_lea.hbm %s1124_s8, 256  ;;  %s879_s22 = scalar_lea.hbm %s1180_s4, 512 }
 0x260   : > { %p876_p6 = scmp.ne.s32.totalorder %s1124_s8, %s875_s13  ;;  %p880_p10 = scmp.lt.u32.totalorder %s1124_s8, %s1180_s4 }
 0x261   : > { %p881_p11 = scmp.lt.u32.totalorder %s879_s22, %s875_s13  ;;  %p883_p13 = scmp.lt.u32.totalorder %s875_s13, %s1124_s8 }
 0x262   : > { %p877_p7 = pnand %p876_p6, %p1019_p4 }
 0x263   : > { %p882_p12 = por %p881_p11, %p880_p10 }
 0x264   : > { %p878_p9 = pneg %p877_p7 }
 0x265   : > { %p884_p0 = por %p883_p13, %p882_p12 }
 0x267   : > { %p885_p1 = pnand %p884_p0, %p878_p9 }
 0x269   : > { %888 = shalt.err (!%p885_p1)
}
 0x26a   : > { %s952_s29 = smov 128   ;;  %s953_s30 = smov 8  }
 0x26b   : > { %763 = dma.vmem_to_hbm [thread:$0]  (%p1019_p4), %s1126_s5, 256, %s1124_s8, %s1130_s18, %s952_s29, %s952_s29, %s953_s30  }
 0x26c PF: > { %p769_p2 = scmp.ge.s32.totalorder %s939_s20, 2  ;;  %s636_s6 = sand.u32 1, %s919_s15  }
 0x26d   : > { %s637_s7 = scalar_lea.sflag [#allocation4], %s636_s6 }
 0x26e   : > { %p766_p3 = pnand %p769_p2, %p1026_p8 }
 0x270   : > { %914 = dma.done.wait (!%p766_p3), %s637_s7, 256  }
 0x271   : > { %916 = vsyncadd (!%p766_p3), %s637_s7, 4294967040  ;;  %s17_s20 = sadd.s32 1, %s939_s20   ;;  %s1183_s15 = smov %s923_s16 }
 0x272   : > { %p14_p5 = scmp.ge.s32.totalorder %s17_s20, 4   ;;  %s1184_s16 = smov %s927_s17 }
 0x273   : > { %s1185_s17 = smov %s1032_s28  ;;  %s1186_s18 = smov %s935_s19 }
 0x274   : > { %s1187_s19 = smov %s1189_s23  ;;  %16 = sbr.rel (!%p14_p5) target bundleno = 4 (0x4), region = 84 }
 0x27b   :  { %642 = vsyncpa [#allocation4], 1 }
 0x27c   :  { %644 = vsyncpa [#allocation4 + $0x1], 1 }

</bundles_post_ra>
